<compile_context>
chip_gen: v7x
topology: tpu7x:2x2x1
jax: 0.10.0
libtpu: 0.0.40
codegen_flags: <defaults>
</compile_context>

<pallas_src>
import functools

import jax
import jax.numpy as jnp
from jax.experimental import pallas as pl
from jax.experimental.pallas import tpu as pltpu

_LANE = 128


def _round_up(x, m):
    return ((x + m - 1) // m) * m


def _round_down(x, m):
    return (x // m) * m


def _sublane(dtype):
    # Native sublane multiple: 8 (f32), 16 (bf16/f16), 32 (int8/fp8).
    return 8 * (4 // jnp.dtype(dtype).itemsize)


def _resident_spec(shape, index_map):
    """BlockSpec for a VMEM-resident operand (constant index_map).

    Single-buffer it when supported: a second buffer for a never-changing block
    is pure VMEM waste (several MB for a large W1).
    """
    if hasattr(pl, "Buffered"):
        try:
            return pl.BlockSpec(shape, index_map, pipeline_mode=pl.Buffered(1))
        except TypeError:
            pass
    return pl.BlockSpec(shape, index_map)


# ----------------------------------------------------------------------------
# Kernels
# ----------------------------------------------------------------------------
def _head_kernel_resident(x_ref, w1_ref, b1_ref, w2_ref, b2_ref, o_ref, *,
                          mxu_dtype):
    # x_ref: (TM, Hp)  w1_ref: (Hp, Hp)  b1_ref: (1, Hp)
    # w2_ref: (Hp, Lp) b2_ref: (1, Lp)   o_ref: (TM, Lp)
    x = x_ref[...].astype(mxu_dtype)
    w1 = w1_ref[...].astype(mxu_dtype)
    # dense: x @ W1 (MXU, f32 accumulate); bias + tanh in f32 (VPU/EUP).
    h = jnp.dot(x, w1, preferred_element_type=jnp.float32)
    h = jnp.tanh(h + b1_ref[...].astype(jnp.float32))
    # out_proj: tanh(h) @ W2 + b2
    out = jnp.dot(h.astype(mxu_dtype), w2_ref[...].astype(mxu_dtype),
                  preferred_element_type=jnp.float32)
    out = out + b2_ref[...].astype(jnp.float32)
    o_ref[...] = out.astype(o_ref.dtype)


def _head_kernel_ktiled(x_ref, w1_ref, b1_ref, w2_ref, b2_ref, o_ref, h_acc, *,
                        mxu_dtype):
    # grid = (M tiles, K tiles); K tiles the dense-matmul contraction (input H).
    # x_ref: (TM, TK)  w1_ref: (TK, Hp)  h_acc: (TM, Hp) f32 scratch
    k = pl.program_id(1)

    @pl.when(k == 0)
    def _():
        h_acc[...] = jnp.zeros_like(h_acc)

    h_acc[...] += jnp.dot(x_ref[...].astype(mxu_dtype),
                          w1_ref[...].astype(mxu_dtype),
                          preferred_element_type=jnp.float32)

    @pl.when(k == pl.num_programs(1) - 1)
    def _():
        h = jnp.tanh(h_acc[...] + b1_ref[...].astype(jnp.float32))
        out = jnp.dot(h.astype(mxu_dtype), w2_ref[...].astype(mxu_dtype),
                      preferred_element_type=jnp.float32)
        o_ref[...] = (out + b2_ref[...].astype(jnp.float32)).astype(o_ref.dtype)


# ----------------------------------------------------------------------------
# Wrapper
# ----------------------------------------------------------------------------
def prepare_model_head_params(w_dense, b_dense, w_out, b_out, *,
                              mxu_dtype=None):
    """Pad/cast parameters once (hoisted out of the per-call path).

    Weights are stored (in, out). H and L are zero-padded to multiples of 128
    so the lane dim of every MXU operand is dense and output stores are
    unmasked. Padded rows/cols are zero, so numerics are unchanged.
    If `mxu_dtype` is given (e.g. jnp.bfloat16) the weights are cast once here
    and the MXU runs in that dtype (biases stay f32).
    """
    H = w_dense.shape[0]
    L = w_out.shape[1]
    if mxu_dtype is None:
        mxu_dtype = w_dense.dtype
    H_pad = max(_LANE, _round_up(H, _LANE))
    L_pad = max(_LANE, _round_up(L, _LANE))

    w1 = jnp.zeros((H_pad, H_pad), mxu_dtype).at[:H, :H].set(
        w_dense.astype(mxu_dtype))
    b1 = jnp.zeros((1, H_pad), jnp.float32).at[:, :H].set(
        b_dense.reshape(1, H).astype(jnp.float32))
    w2 = jnp.zeros((H_pad, L_pad), mxu_dtype).at[:H, :L].set(
        w_out.astype(mxu_dtype))
    b2 = jnp.zeros((1, L_pad), jnp.float32).at[:, :L].set(
        b_out.reshape(1, L).astype(jnp.float32))

    return dict(w1=w1, b1=b1, w2=w2, b2=b2, H=H, L=L,
                H_pad=H_pad, L_pad=L_pad, mxu_dtype=mxu_dtype)


def model_head_apply(features, params, *, block_m=512, block_k=512,
                     resident_weight_budget=20 * 1024 * 1024,
                     tile_vmem_budget=10 * 1024 * 1024):
    """features: (..., H) -> (..., L). Dropout is identity in eval mode."""
    H, L = params["H"], params["L"]
    H_pad, L_pad = params["H_pad"], params["L_pad"]
    w1, b1, w2, b2 = params["w1"], params["b1"], params["w2"], params["b2"]
    mxu_dtype = params["mxu_dtype"]

    *lead, H_in = features.shape
    assert H_in == H, f"feature dim {H_in} != weight dim {H}"
    dtype = features.dtype
    x_itemsize = jnp.dtype(dtype).itemsize
    w_itemsize = jnp.dtype(w1.dtype).itemsize
    sub = _sublane(dtype)

    x2d = features.reshape(-1, H)
    M = x2d.shape[0]
    M_pad = _round_up(max(M, sub), sub)

    # ---- M tile selection: budget includes the f32 intermediates -----------
    per_row_bytes = (2 * (H_pad + L_pad) * x_itemsize      # dbl-buffered x/out
                     + (H_pad + L_pad) * 4)                # f32 h / out temps
    tm = max(sub, tile_vmem_budget // per_row_bytes)
    tm = min(tm, block_m)
    if tm >= 256:
        tm = _round_down(tm, 256)        # MXU-aligned (256-wide on v6e/v7x)
    else:
        tm = max(sub, _round_down(tm, sub))
    if M_pad >= 2 * sub:                 # >=2 grid tiles so both v7x TCs work
        tm = min(tm, max(sub, _round_down(M_pad // 2, sub)))
    tm = max(sub, min(tm, M_pad))
    M_grid = _round_up(M_pad, tm)
    n_m = M_grid // tm

    # Zero-pad rows to the grid and cols to H_pad (sliced off afterwards).
    if (M_grid, H_pad) != (M, H):
        x_p = jnp.zeros((M_grid, H_pad), dtype).at[:M, :H].set(x2d)
    else:
        x_p = x2d

    weight_bytes = ((H_pad * H_pad + H_pad * L_pad) * w_itemsize
                    + (H_pad + L_pad) * 4)
    use_resident = weight_bytes <= resident_weight_budget

    if use_resident:
        # -------- resident-weights path (W1/W2/biases stay in VMEM) ---------
        grid = (n_m,)
        kernel = functools.partial(_head_kernel_resident, mxu_dtype=mxu_dtype)
        in_specs = [
            pl.BlockSpec((tm, H_pad), lambda i: (i, 0)),          # x (pipelined)
            _resident_spec((H_pad, H_pad), lambda i: (0, 0)),     # W1
            _resident_spec((1, H_pad), lambda i: (0, 0)),         # b1
            _resident_spec((H_pad, L_pad), lambda i: (0, 0)),     # W2
            _resident_spec((1, L_pad), lambda i: (0, 0)),         # b2
        ]
        out_specs = pl.BlockSpec((tm, L_pad), lambda i: (i, 0))
        scratch_shapes = ()
        dims = ("parallel",)
        est_bytes = (weight_bytes
                     + 2 * tm * (H_pad + L_pad) * x_itemsize
                     + tm * (H_pad + L_pad) * 4)
    else:
        # -------- K-tiled fallback (large H, e.g. v7x's 64 MiB VMEM) --------
        tk = max(_LANE, _round_down(min(H_pad, block_k), _LANE))
        while H_pad % tk:                 # terminates: 128 always divides H_pad
            tk -= _LANE
        n_k = H_pad // tk
        grid = (n_m, n_k)
        kernel = functools.partial(_head_kernel_ktiled, mxu_dtype=mxu_dtype)
        in_specs = [
            pl.BlockSpec((tm, tk), lambda i, k: (i, k)),          # x tile
            pl.BlockSpec((tk, H_pad), lambda i, k: (k, 0)),       # W1 row tile
            _resident_spec((1, H_pad), lambda i, k: (0, 0)),      # b1
            _resident_spec((H_pad, L_pad), lambda i, k: (0, 0)),  # W2
            _resident_spec((1, L_pad), lambda i, k: (0, 0)),      # b2
        ]
        out_specs = pl.BlockSpec((tm, L_pad), lambda i, k: (i, 0))
        scratch_shapes = (pltpu.VMEM((tm, H_pad), jnp.float32),)
        dims = ("parallel", "arbitrary")
        est_bytes = (2 * tk * H_pad * w_itemsize          # dbl-buffered W1 tile
                     + H_pad * L_pad * w_itemsize + (H_pad + L_pad) * 4
                     + 2 * tm * (tk + L_pad) * x_itemsize
                     + tm * (H_pad + L_pad) * 4)

    vmem_limit = int(min(60 * 1024 * 1024,
                         max(8 * 1024 * 1024, 1.3 * est_bytes)))

    cost = pl.CostEstimate(
        flops=2 * M_grid * H_pad * H_pad + 2 * M_grid * H_pad * L_pad,
        transcendentals=M_grid * H_pad,
        bytes_accessed=(M_grid * H_pad * x_itemsize
                        + (H_pad * H_pad + H_pad * L_pad) * w_itemsize
                        + (H_pad + L_pad) * 4
                        + M_grid * L_pad * x_itemsize),
    )

    out_padded = pl.pallas_call(
        kernel,
        out_shape=jax.ShapeDtypeStruct((M_grid, L_pad), dtype),
        grid_spec=pltpu.PrefetchScalarGridSpec(
            num_scalar_prefetch=0,
            grid=grid,
            in_specs=in_specs,
            out_specs=out_specs,
            scratch_shapes=scratch_shapes,
        ),
        compiler_params=pltpu.CompilerParams(
            dimension_semantics=dims,
            vmem_limit_bytes=vmem_limit,
        ),
        cost_estimate=cost,
    )(x_p, w1, b1, w2, b2)

    return out_padded[:M, :L].reshape(*lead, L)


def model_head(features, w_dense, b_dense, w_out, b_out, *, mxu_dtype=None,
               **kwargs):
    """Convenience wrapper: pad params and apply in one call."""
    params = prepare_model_head_params(w_dense, b_dense, w_out, b_out,
                                       mxu_dtype=mxu_dtype)
    return model_head_apply(features, params, **kwargs)


# TODO(synk): training-mode dropout (stochastic masking) is not implemented;
# dropout layers are identity in eval/inference mode, matching this kernel.

if __name__ == "__main__":
    # ---- 1) Demo config consistent with the module: hidden=32, labels=4 ----
    batch, seq, hidden, num_labels = 2, 8, 32, 4
    key = jax.random.PRNGKey(0)
    k_x, k_w1, k_b1, k_w2, k_b2 = jax.random.split(key, 5)

    features = jax.random.normal(k_x, (batch, seq, hidden), dtype=jnp.float32)
    w_dense = jax.random.normal(k_w1, (hidden, hidden), jnp.float32) * 0.05
    b_dense = jax.random.normal(k_b1, (hidden,), jnp.float32) * 0.01
    w_out = jax.random.normal(k_w2, (hidden, num_labels), jnp.float32) * 0.05
    b_out = jax.random.normal(k_b2, (num_labels,), jnp.float32) * 0.01

    params = prepare_model_head_params(w_dense, b_dense, w_out, b_out)
    out = jax.block_until_ready(model_head_apply(features, params))

    ref = jnp.tanh(features @ w_dense + b_dense) @ w_out + b_out
    assert out.shape == (batch, seq, num_labels)
    assert jnp.allclose(out, ref, atol=1e-5, rtol=1e-5)

    # ---- 2) Exercise the K-tiled fallback path (forced tiny budget) --------
    H2, L2, M2 = 256, 4, 48
    k_x2, k_w12, k_w22 = jax.random.split(jax.random.PRNGKey(1), 3)
    x2 = jax.random.normal(k_x2, (M2, H2), jnp.float32)
    w1_2 = jax.random.normal(k_w12, (H2, H2), jnp.float32) * 0.03
    b1_2 = jnp.zeros((H2,), jnp.float32)
    w2_2 = jax.random.normal(k_w22, (H2, L2), jnp.float32) * 0.03
    b2_2 = jnp.zeros((L2,), jnp.float32)
    out2 = jax.block_until_ready(
        model_head(x2, w1_2, b1_2, w2_2, b2_2,
                   resident_weight_budget=1, block_k=128))
    ref2 = jnp.tanh(x2 @ w1_2 + b1_2) @ w2_2 + b2_2
    assert jnp.allclose(out2, ref2, atol=1e-4, rtol=1e-4)

    # ---- 3) bf16 mixed-precision MXU path (loose tolerance) ----------------
    out3 = jax.block_until_ready(
        model_head(features, w_dense, b_dense, w_out, b_out,
                   mxu_dtype=jnp.bfloat16))
    assert jnp.allclose(out3, ref, atol=3e-2, rtol=3e-2)

    print("KERNEL_OK")
</pallas_src>

<mosaic_0001>
module attributes {stable_mosaic.version = 11 : i64} {
  func.func @_head_kernel_resident(%arg0: i32, %arg1: memref<8x128xf32, #tpu.memory_space<vmem>>, %arg2: memref<128x128xf32, #tpu.memory_space<vmem>>, %arg3: memref<1x128xf32, #tpu.memory_space<vmem>>, %arg4: memref<128x128xf32, #tpu.memory_space<vmem>>, %arg5: memref<1x128xf32, #tpu.memory_space<vmem>>, %arg6: memref<8x128xf32, #tpu.memory_space<vmem>>) attributes {dimension_semantics = [#tpu.dimension_semantics<parallel>], iteration_bounds = array<i64: 2>, scalar_prefetch = 0 : i64, scratch_operands = 0 : i64, tpu.core_type = #tpu.core_type<tc>, window_params = [{transform_indices = @transform_0, window_bounds = array<i64: 8, 128>}, {pipeline_mode = #tpu.pipeline_mode<synchronous>, transform_indices = @transform_1, window_bounds = array<i64: 128, 128>}, {pipeline_mode = #tpu.pipeline_mode<synchronous>, transform_indices = @transform_2, window_bounds = array<i64: 1, 128>}, {pipeline_mode = #tpu.pipeline_mode<synchronous>, transform_indices = @transform_3, window_bounds = array<i64: 128, 128>}, {pipeline_mode = #tpu.pipeline_mode<synchronous>, transform_indices = @transform_4, window_bounds = array<i64: 1, 128>}, {transform_indices = @transform_5, window_bounds = array<i64: 8, 128>}]} {
    %c0 = arith.constant 0 : index
    %c0_0 = arith.constant 0 : index
    %0 = vector.load %arg1[%c0, %c0_0] : memref<8x128xf32, #tpu.memory_space<vmem>>, vector<8x128xf32>
    %c0_1 = arith.constant 0 : index
    %c0_2 = arith.constant 0 : index
    %1 = vector.load %arg2[%c0_1, %c0_2] : memref<128x128xf32, #tpu.memory_space<vmem>>, vector<128x128xf32>
    %cst = arith.constant dense<0.000000e+00> : vector<8x128xf32>
    %2 = tpu.matmul %0, %1, %cst {dimension_numbers = #tpu.dot_dimension_numbers<[1], [0], [0], [1], [0, 0, 1, 1], [], []>} : vector<8x128xf32>, vector<128x128xf32>, vector<8x128xf32> -> vector<8x128xf32>
    %c0_3 = arith.constant 0 : index
    %c0_4 = arith.constant 0 : index
    %3 = vector.load %arg3[%c0_3, %c0_4] : memref<1x128xf32, #tpu.memory_space<vmem>>, vector<1x128xf32>
    %4 = vector.broadcast %3 : vector<1x128xf32> to vector<8x128xf32>
    %5 = arith.addf %2, %4 : vector<8x128xf32>
    %6 = math.tanh %5 : vector<8x128xf32>
    %c0_5 = arith.constant 0 : index
    %c0_6 = arith.constant 0 : index
    %7 = vector.load %arg4[%c0_5, %c0_6] : memref<128x128xf32, #tpu.memory_space<vmem>>, vector<128x128xf32>
    %cst_7 = arith.constant dense<0.000000e+00> : vector<8x128xf32>
    %8 = tpu.matmul %6, %7, %cst_7 {dimension_numbers = #tpu.dot_dimension_numbers<[1], [0], [0], [1], [0, 0, 1, 1], [], []>} : vector<8x128xf32>, vector<128x128xf32>, vector<8x128xf32> -> vector<8x128xf32>
    %c0_8 = arith.constant 0 : index
    %c0_9 = arith.constant 0 : index
    %9 = vector.load %arg5[%c0_8, %c0_9] : memref<1x128xf32, #tpu.memory_space<vmem>>, vector<1x128xf32>
    %10 = vector.broadcast %9 : vector<1x128xf32> to vector<8x128xf32>
    %11 = arith.addf %8, %10 : vector<8x128xf32>
    %c0_10 = arith.constant 0 : index
    %c0_11 = arith.constant 0 : index
    %12 = vector.load %arg6[%c0_10, %c0_11] : memref<8x128xf32, #tpu.memory_space<vmem>>, vector<8x128xf32>
    tpu.vector_store %arg6[%c0_10, %c0_11], %11 {strides = array<i32>} : memref<8x128xf32, #tpu.memory_space<vmem>>, vector<8x128xf32>,
    return
  }
  func.func @transform_0(%arg0: i32) -> (i32, i32) {
    %c0_i32 = arith.constant 0 : i32
    %c0_i32_0 = arith.constant 0 : i32
    return %arg0, %c0_i32 : i32, i32
  }
  func.func @transform_1(%arg0: i32) -> (i32, i32) {
    %c0_i32 = arith.constant 0 : i32
    %c0_i32_0 = arith.constant 0 : i32
    %c0_i32_1 = arith.constant 0 : i32
    return %c0_i32, %c0_i32_0 : i32, i32
  }
  func.func @transform_2(%arg0: i32) -> (i32, i32) {
    %c0_i32 = arith.constant 0 : i32
    %c0_i32_0 = arith.constant 0 : i32
    %c0_i32_1 = arith.constant 0 : i32
    return %c0_i32, %c0_i32_0 : i32, i32
  }
  func.func @transform_3(%arg0: i32) -> (i32, i32) {
    %c0_i32 = arith.constant 0 : i32
    %c0_i32_0 = arith.constant 0 : i32
    %c0_i32_1 = arith.constant 0 : i32
    return %c0_i32, %c0_i32_0 : i32, i32
  }
  func.func @transform_4(%arg0: i32) -> (i32, i32) {
    %c0_i32 = arith.constant 0 : i32
    %c0_i32_0 = arith.constant 0 : i32
    %c0_i32_1 = arith.constant 0 : i32
    return %c0_i32, %c0_i32_0 : i32, i32
  }
  func.func @transform_5(%arg0: i32) -> (i32, i32) {
    %c0_i32 = arith.constant 0 : i32
    %c0_i32_0 = arith.constant 0 : i32
    return %arg0, %c0_i32 : i32, i32
  }
}

</mosaic_0001>

<bundles_post_ra>
// kernel: tpu_custom_call.1
= control target key start
LH: loop header
LB: loop body
LE: loop exit
PB: predicated region body
PF: predicated region fallthrough
CT: control target
= control target key end

     0   :  { %10 = vsyncpa [#allocation3], 0  ;;  %s1260_s0 = inlined_call_operand.hbm [shape: f32[16,128], index: 0, kind: input, shape index: {}]   ;;  %s1261_s1 = inlined_call_operand.hbm [shape: f32[128,128], index: 1, kind: input, shape index: {}]   ;;  %s1262_s2 = inlined_call_operand.vmem [shape: f32[1,128], index: 2, kind: input, shape index: {}]   ;;  %s1263_s3 = inlined_call_operand.hbm [shape: f32[128,128], index: 3, kind: input, shape index: {}]   ;;  %s1264_s4 = inlined_call_operand.vmem [shape: f32[1,128], index: 4, kind: input, shape index: {}]   ;;  %s1265_s5 = inlined_call_operand.hbm [shape: f32[16,128], index: 5, kind: output, shape index: {}]  }
   0x1   :  { %12 = vsyncpa [#allocation3 + $0x1], 0 }
   0x2   :  { %13 = vsyncpa [#allocation6], 0 }
   0x3   :  { %14 = vsyncpa [#allocation4], 0 }
   0x4   :  { %16 = vsyncpa [#allocation4 + $0x1], 0  ;;  %s1002_s18 = smov 0   ;;  %s1004_s19 = smov 0  }
   0x5   :  { %s1006_s20 = smov 0   ;;  %s1008_s21 = smov 0  }
   0x6 LB: > { %s1023_s22 = sadd.s32 4294967295, %s961_s21   ;;  %s561_s23 = sadd.s32 4294967294, %s961_s21   ;;  %s961_s21 = sphi %s1008_s21, %s1285_s21   ;;  %s957_s20 = sphi %s1006_s20, %s1284_s20   ;;  %s953_s19 = sphi %s1004_s19, %s1283_s19   ;;  %s949_s18 = sphi %s1002_s18, %s1282_s18  }
   0x7   : > { %p42_p0 = scmp.ne.s32.totalorder %s953_s19, %s949_s18  ;;  %p1266_p1 = scmp.eq.s32.totalorder %s1023_s22, 0 }
   0x8   : > { %p156_p3 = scmp.eq.s32.totalorder %s561_s23, 1  ;;  %p562_p5 = scmp.ge.s32.totalorder %s961_s21, 1 }
   0x9   : > { %p1032_p4 = por %p1266_p1, %p42_p0  ;;  %p163_p7 = scmp.lt.s32.totalorder %s961_s21, 3 }
   0xa   : > { %p1037_p6 = por %p156_p3, %p42_p0  ;;  %s963_s27 = smov [#allocation5]  }
   0xb   : > { %s1269_s24 = scalar_select %p1032_p4, 1, 0 }
   0xc   : > { %s1270_s25 = scalar_select %p1037_p6, 1, 0 }
   0xd   : > { %p1042_p8 = pnand %p562_p5, %p163_p7  ;;  %s175_s28 = sshll.u32 %s963_s27, 4  ;;  %s1046_s28 = int_to_ptr.vmem [resolvable:$true] %s175_s28 }
   0xe   : > { %s964_s30 = smov [#allocation7]   ;;  %s805_s9 = scalar_lea.hbm %s1261_s1, 2048 }
   0xf   : > { %p743_p9 = pneg %p1042_p8  ;;  %s191_s6 = sshll.u32 %s964_s30, 4  ;;  %s1057_s6 = int_to_ptr.vmem [resolvable:$true] %s191_s6 }
  0x10   : > { %p806_p12 = scmp.ne.s32.totalorder %s1261_s1, %s805_s9  ;;  %p812_p5 = scmp.lt.u32.totalorder %s805_s9, %s1261_s1 }
  0x11   : > { %p1053_p11 = pnand %p743_p9, %p1266_p1 }
  0x13   : > { %p807_p13 = pneg %p1053_p11 }
  0x15   : > { %p808_p0 = pnand %p807_p13, %p806_p12 }
  0x17   : > { %p809_p3 = pneg %p808_p0 }
  0x19   : > { %p814_p7 = pnand %p812_p5, %p809_p3 }
  0x1b   : > { %817 = shalt.err (!%p814_p7)
}
  0x1c   : > { %s818_s14 = scalar_lea.vmem %s1046_s28, 2048  ;;  %p826_p2 = scmp.lt.s32.totalorder %s1046_s28, %s1046_s28 }
  0x1d   : > { %p819_p9 = scmp.ne.s32.totalorder %s1046_s28, %s818_s14  ;;  %p827_p12 = scmp.lt.s32.totalorder %s818_s14, %s818_s14 }
  0x1f   : > { %p821_p10 = pnand %p819_p9, %p807_p13  ;;  %p828_p0 = por %p827_p12, %p826_p2 }
  0x21   : > { %p822_p1 = pneg %p821_p10 }
  0x23   : > { %p829_p6 = pnand %p828_p0, %p822_p1 }
  0x25   : > { %832 = shalt.err (!%p829_p6)
}
  0x26   : > { %s965_s15 = smov 128   ;;  %s966_s16 = smov 8  }
  0x27   : > { %746 = dma.hbm_to_vmem [thread:$0]  (!%p1053_p11), %s1261_s1, 2048, %s1046_s28, [#allocation6], %s965_s15, %s965_s15, %s966_s16  }
  0x28   : > { %s833_s7 = scalar_lea.hbm %s1263_s3, 2048 }
  0x29   : > { %p834_p2 = scmp.ne.s32.totalorder %s1263_s3, %s833_s7  ;;  %p840_p10 = scmp.lt.u32.totalorder %s833_s7, %s1263_s3 }
  0x2b   : > { %p836_p1 = pnand %p834_p2, %p807_p13 }
  0x2d   : > { %p837_p6 = pneg %p836_p1 }
  0x2f   : > { %p842_p3 = pnand %p840_p10, %p837_p6 }
  0x31   : > { %845 = shalt.err (!%p842_p3)
}
  0x32   : > { %s846_s28 = scalar_lea.vmem %s1057_s6, 2048  ;;  %p854_p12 = scmp.lt.s32.totalorder %s1057_s6, %s1057_s6 }
  0x33   : > { %p847_p5 = scmp.ne.s32.totalorder %s1057_s6, %s846_s28  ;;  %p855_p0 = scmp.lt.s32.totalorder %s846_s28, %s846_s28 }
  0x35   : > { %p849_p7 = pnand %p847_p5, %p807_p13  ;;  %p856_p2 = por %p855_p0, %p854_p12 }
  0x37   : > { %p850_p9 = pneg %p849_p7 }
  0x39   : > { %p857_p1 = pnand %p856_p2, %p850_p9 }
  0x3b   : > { %860 = shalt.err (!%p857_p1)
}
  0x3c   : > { %749 = dma.hbm_to_vmem [thread:$0]  (!%p1053_p11), %s1263_s3, 2048, %s1057_s6, [#allocation6], %s965_s15, %s965_s15, %s966_s16  }
  0x3d   : > { %s1112_s14 = sadd.s32 1, %s961_s21   ;;  %s29_s29 = sadd.s32 1, %s957_s20 }
  0x3e   : > { %s26_s17 = ssub.s32 %s961_s21, %s1112_s14  ;;  %p36_p13 = scmp.ne.s32.totalorder %s957_s20, %s953_s19 }
  0x3f   : > { %p27_p6 = scmp.eq.s32.totalorder %s26_s17, 0  ;;  %p37_p10 = scmp.eq.s32.totalorder %s961_s21, 0 }
  0x40   : > { %p1273_p3 = scmp.eq.s32.totalorder %s1023_s22, 1  ;;  %p760_p7 = scmp.lt.s32.totalorder %s961_s21, 2 }
  0x41   : > { %s1128_s27 = scalar_select %p27_p6, %s957_s20, %s29_s29  }
  0x42   : > { %p1122_p5 = por %p1273_p3, %p36_p13  ;;  %p38_p9 = por %p37_p10, %p36_p13 }
  0x43   : > { %s208_s30 = sand.u32 1, %s957_s20   ;;  %s567_s6 = sshll.u32 %s961_s21, 7 }
  0x44   : > { %s1274_s23 = scalar_select %p1122_p5, 1, 0 }
  0x45   : > { %s566_s7 = sshll.u32 %s208_s30, 3  ;;  %s1135_s8 = scalar_lea.hbm %s1260_s0, %s567_s6 }
  0x46   : > { %s212_s9 = scalar_lea.vmem [#allocation2], %s566_s7  ;;  %p1139_p11 = pnand %p760_p7, %p38_p9 }
  0x47   : > { %s219_s10 = sshll.u32 %s212_s9, 4  ;;  %s209_s28 = scalar_lea.sflag [#allocation3], %s208_s30  ;;  %s1137_s10 = int_to_ptr.vmem [resolvable:$true] %s219_s10 }
  0x48   : > { %s861_s12 = scalar_lea.hbm %s1135_s8, 128  ;;  %p863_p0 = pneg %p1139_p11 }
  0x49   : > { %p862_p12 = scmp.ne.s32.totalorder %s1135_s8, %s861_s12  ;;  %s866_s17 = scalar_lea.hbm %s1260_s0, 256 }
  0x4a   : > { %p867_p13 = scmp.lt.u32.totalorder %s1135_s8, %s1260_s0  ;;  %p868_p6 = scmp.lt.u32.totalorder %s866_s17, %s861_s12 }
  0x4b   : > { %p864_p2 = pnand %p863_p0, %p862_p12  ;;  %p870_p3 = scmp.lt.u32.totalorder %s861_s12, %s1135_s8 }
  0x4c   : > { %p869_p10 = por %p868_p6, %p867_p13 }
  0x4d   : > { %p865_p1 = pneg %p864_p2 }
  0x4e   : > { %p871_p7 = por %p870_p3, %p869_p10 }
  0x50   : > { %p872_p9 = pnand %p871_p7, %p865_p1 }
  0x52   : > { %875 = shalt.err (!%p872_p9)
}
  0x53   : > { %s876_s30 = scalar_lea.vmem %s1137_s10, 128  ;;  %s967_s15 = smov [#allocation2]  }
  0x54   : > { %p877_p12 = scmp.ne.s32.totalorder %s1137_s10, %s876_s30  ;;  %s881_s16 = sshll.u32 %s967_s15, 4  ;;  %s882_s16 = int_to_ptr.vmem [resolvable:$false] %s881_s16 }
  0x55   : > { %s883_s9 = scalar_lea.vmem %s882_s16, 256  ;;  %p884_p4 = scmp.lt.s32.totalorder %s1137_s10, %s882_s16 }
  0x56   : > { %p879_p2 = pnand %p877_p12, %p863_p0  ;;  %p885_p13 = scmp.lt.s32.totalorder %s883_s9, %s876_s30 }
  0x58   : > { %p880_p5 = pneg %p879_p2  ;;  %p886_p6 = por %p885_p13, %p884_p4 }
  0x5a   : > { %p887_p10 = pnand %p886_p6, %p880_p5 }
  0x5c   : > { %890 = shalt.err (!%p887_p10)
}
  0x5d   : > { %753 = dma.hbm_to_vmem [thread:$0]  (!%p1139_p11), %s1135_s8, 128, %s1137_s10, %s209_s28  }
  0x5e   : > { %228 = sbr.rel (%p1042_p8) target bundleno = 592 (0x250), region = 40  ;;  %s1171_s12 = sand.u32 (!%p1042_p8), 1, %s953_s19  }
  0x5f   : > { %s569_s13 = sshll.u32 (!%p1042_p8), %s1171_s12, 3  ;;  %s231_s29 = scalar_lea.sflag (!%p1042_p8), [#allocation3], %s1171_s12 }
  0x60   : > { %s1177_s17 = scalar_lea.vmem (!%p1042_p8), [#allocation2], %s569_s13  ;;  %p1276_p4 = scmp.ne.s32.totalorder (!%p1042_p8), %s1269_s24, 0 }
  0x65   : > { %936 = dma.done.wait (%p1276_p4), %s231_s29, 128  }
  0x66   : > { %938 = vsyncadd (%p1276_p4), %s231_s29, 4294967168  ;;  %p1277_p5 = scmp.eq.s32.totalorder %s1023_s22, 0 }
  0x68   : > { %940 = dma.done.wait (%p1277_p5), [#allocation6], 4096   ;;  %p1278_p8 = pmov %p1277_p5 }
  0x69   : > { %v968_v0 = vmov 0.0|0.0   ;;  %vm969_vm0 = vmmov 0   ;;  %v970_v1 = vmov 0.0   ;;  %v270_v2 = vld [vmem:[#allocation5] sm:$0xff]  ;;  %v271_v3 = vld [vmem:[#allocation5 + $0x8] sm:$0xff]  ;;  %v272_v4 = vld [vmem:[#allocation5 + $0x10] sm:$0xff] }
  0x6a   : > { %942 = vsyncadd (%p1278_p8), [#allocation6], 4294963200  ;;  %683 = vmatprep.subr.bf16.mxu0 %v968_v0  ;;  %645 = vmatprep.mubr.msk.f32.mxu0 %vm969_vm0, %v970_v1  ;;  %v684_v5 = vpack.c.bf16 %v271_v3, %v270_v2  ;;  %v273_v6 = vld [vmem:[#allocation5 + $0x18] sm:$0xff]  ;;  %v274_v8 = vld [vmem:[#allocation5 + $0x20] sm:$0xff]  ;;  %s576_s11 = sshll.u32 %s1023_s22, 7  ;;  %s268_s28 = scalar_lea.vmem [#allocation8], %s569_s13 }
  0x6b   : > { %707 = vmatprep.subr.bf16.mxu1 %v968_v0  ;;  %680 = vmatprep.mubr.msk.f32.mxu1 %vm969_vm0, %v970_v1  ;;  %v687_v7 = vpack.c.bf16 %v273_v6, %v272_v4  ;;  %v275_v9 = vld [vmem:[#allocation5 + $0x28] sm:$0xff]  ;;  %v364_v10 = vld [vmem:[#allocation7] sm:$0xff]  ;;  %v366_v12 = vld [vmem:[#allocation7 + $0x10] sm:$0xff]  ;;  %s472_s7 = sshll.u32 %s268_s28, 4  ;;  %s1216_s15 = scalar_lea.hbm %s1265_s5, %s576_s11  ;;  %s1218_s7 = int_to_ptr.vmem [resolvable:$true] %s472_s7 }
  0x6c   : > { %685 = vmatpush3.bf16.msra.mxu0 %v684_v5  ;;  %v365_v11 = vld [vmem:[#allocation7 + $0x8] sm:$0xff]  ;;  %v367_v13 = vld [vmem:[#allocation7 + $0x18] sm:$0xff]  ;;  %v690_v14 = vpack.c.bf16 %v275_v9, %v274_v8  ;;  %v276_v16 = vld [vmem:[#allocation5 + $0x30] sm:$0xff]  ;;  %s459_s16 = scalar_lea.sflag [#allocation4], %s1171_s12  ;;  %s891_s9 = scalar_lea.vmem %s1218_s7, 128 }
  0x6d   : > { %686 = vmatprep.subr.bf16.mxu0 %v968_v0  ;;  %v708_v15 = vpack.c.bf16 %v365_v11, %v364_v10  ;;  %v277_v17 = vld [vmem:[#allocation5 + $0x38] sm:$0xff]  ;;  %v711_v18 = vpack.c.bf16 %v367_v13, %v366_v12  ;;  %v368_v19 = vld [vmem:[#allocation7 + $0x20] sm:$0xff]  ;;  %v369_v20 = vld [vmem:[#allocation7 + $0x28] sm:$0xff]  ;;  %p892_p11 = scmp.ne.s32.totalorder %s1218_s7, %s891_s9  ;;  %p1279_p0 = scmp.ne.s32.totalorder %s1274_s23, 0 }
  0x6e   : > { %v693_v21 = vpack.c.bf16 %v277_v17, %v276_v16  ;;  %v278_v22 = vld [vmem:[#allocation5 + $0x40] sm:$0xff]  ;;  %v279_v23 = vld [vmem:[#allocation5 + $0x48] sm:$0xff]  ;;  %v714_v24 = vpack.c.bf16 %v369_v20, %v368_v19  ;;  %v370_v25 = vld [vmem:[#allocation7 + $0x30] sm:$0xff]  ;;  %s971_s22 = smov [#allocation8]  }
  0x6f   : > { %709 = vmatpush3.bf16.msra.mxu1 %v708_v15  ;;  %v371_v26 = vld [vmem:[#allocation7 + $0x38] sm:$0xff]  ;;  %v696_v27 = vpack.c.bf16 %v279_v23, %v278_v22  ;;  %v280_v28 = vld [vmem:[#allocation5 + $0x50] sm:$0xff]  ;;  %v372_v31 = vld [vmem:[#allocation7 + $0x40] sm:$0xff]  ;;  %p893_p1 = pnand %p892_p11, %p1279_p0  ;;  %s895_s13 = sshll.u32 %s971_s22, 4  ;;  %s896_s13 = int_to_ptr.vmem [resolvable:$false] %s895_s13 }
  0x70   : > { %688 = vmatpush3.bf16.msra.mxu0 %v687_v7  ;;  %710 = vmatprep.subr.bf16.mxu1 %v968_v0  ;;  %v281_v29 = vld [vmem:[#allocation5 + $0x58] sm:$0xff]  ;;  %v717_v30 = vpack.c.bf16 %v371_v26, %v370_v25  ;;  %v373_v32 = vld [vmem:[#allocation7 + $0x48] sm:$0xff]  ;;  %v282_v34 = vld [vmem:[#allocation5 + $0x60] sm:$0xff]  ;;  %s897_s29 = scalar_lea.vmem %s896_s13, 256  ;;  %p898_p7 = scmp.lt.s32.totalorder %s1218_s7, %s896_s13 }
  0x71   : > { %689 = vmatprep.subr.bf16.mxu0 %v968_v0  ;;  %v699_v33 = vpack.c.bf16 %v281_v29, %v280_v28  ;;  %v283_v35 = vld [vmem:[#allocation5 + $0x68] sm:$0xff]  ;;  %v720_v36 = vpack.c.bf16 %v373_v32, %v372_v31  ;;  %v284_v38 = vld [vmem:[#allocation5 + $0x70] sm:$0xff]  ;;  %v285_v39 = vld [vmem:[#allocation5 + $0x78] sm:$0xff]  ;;  %p894_p3 = pneg %p893_p1  ;;  %p899_p9 = scmp.lt.s32.totalorder %s897_s29, %s891_s9 }
  0x72   : > { %v702_v37 = vpack.c.bf16 %v283_v35, %v282_v34  ;;  %v705_v40 = vpack.c.bf16 %v285_v39, %v284_v38  ;;  %v269_v41 = vld [vmem:[%s1177_s17] sm:$0xff]  ;;  %v376_v45 = vld [vmem:[#allocation7 + $0x60] sm:$0xff]  ;;  %v377_v46 = vld [vmem:[#allocation7 + $0x68] sm:$0xff] }
  0x73   : > { %712 = vmatpush3.bf16.msra.mxu1 %v711_v18  ;;  %v374_v42 = vld [vmem:[#allocation7 + $0x50] sm:$0xff]  ;;  %v375_v43 = vld [vmem:[#allocation7 + $0x58] sm:$0xff]  ;;  %v726_v47 = vpack.c.bf16 %v377_v46, %v376_v45  ;;  %p900_p12 = por %p899_p9, %p898_p7 }
  0x74   : > { %691 = vmatpush3.bf16.msra.mxu0 %v690_v14  ;;  %713 = vmatprep.subr.bf16.mxu1 %v968_v0  ;;  %v723_v44 = vpack.c.bf16 %v375_v43, %v374_v42  ;;  %v378_v48 = vld [vmem:[#allocation7 + $0x70] sm:$0xff]  ;;  %v379_v49 = vld [vmem:[#allocation7 + $0x78] sm:$0xff] }
  0x75   : > { %692 = vmatprep.subr.bf16.mxu0 %v968_v0  ;;  %v729_v50 = vpack.c.bf16 %v379_v49, %v378_v48  ;;  %v573_v51 = vld [vmem:[%s1262_s2] ss:$0 sm:$0xff]  ;;  %p901_p2 = pnand %p900_p12, %p894_p3 }
  0x76   : > { %v574_v56 = vld [vmem:[%s1264_s4] ss:$0 sm:$0xff] }
  0x77   : > { %715 = vmatpush3.bf16.msra.mxu1 %v714_v24 }
  0x78   : > { %694 = vmatpush3.bf16.msra.mxu0 %v693_v21  ;;  %716 = vmatprep.subr.bf16.mxu1 %v968_v0 }
  0x79   : > { %695 = vmatprep.subr.bf16.mxu0 %v968_v0 }
  0x7b   : > { %718 = vmatpush3.bf16.msra.mxu1 %v717_v30 }
  0x7c   : > { %697 = vmatpush3.bf16.msra.mxu0 %v696_v27  ;;  %719 = vmatprep.subr.bf16.mxu1 %v968_v0 }
  0x7d   : > { %698 = vmatprep.subr.bf16.mxu0 %v968_v0 }
  0x7f   : > { %721 = vmatpush3.bf16.msra.mxu1 %v720_v36 }
  0x80   : > { %700 = vmatpush3.bf16.msra.mxu0 %v699_v33  ;;  %722 = vmatprep.subr.bf16.mxu1 %v968_v0 }
  0x81   : > { %701 = vmatprep.subr.bf16.mxu0 %v968_v0 }
  0x83   : > { %724 = vmatpush3.bf16.msra.mxu1 %v723_v44 }
  0x84   : > { %703 = vmatpush3.bf16.msra.mxu0 %v702_v37  ;;  %725 = vmatprep.subr.bf16.mxu1 %v968_v0 }
  0x85   : > { %704 = vmatprep.subr.bf16.mxu0 %v968_v0 }
  0x87   : > { %727 = vmatpush3.bf16.msra.mxu1 %v726_v47 }
  0x88   : > { %706 = vmatpush3.bf16.msra.mxu0 %v705_v40  ;;  %728 = vmatprep.subr.bf16.mxu1 %v968_v0 }
  0x8b   : > { %646 = vmatmul.mubr.f32.vlgmr.msra.gmra.mrb[0].mxu0 %v269_v41  ;;  %730 = vmatpush3.bf16.msra.mxu1 %v729_v50 }
 0x15e   : > { %v359_v52 = vpop.f32.mrb[0].mxu0 }
 0x15f   : > { %v360_v53 = vadd.f32 %v573_v51, %v359_v52  ;;  %v647_v54 = vpop.f32.mrb[1].mxu0 }
 0x161   : > { %803 = vtanh.f32 %v360_v53 }
 0x16b   : > { %v804_v55 = vpop.eup %803 }
 0x16c   : > { %681 = vmatmul.mubr.f32.vlgmr.msra.gmra.mrb[0].mxu1 %v804_v55 }
 0x23f   : > { %v453_v57 = vpop.f32.mrb[0].mxu1 }
 0x240   : > { %v454_v58 = vadd.f32 %v574_v56, %v453_v57  ;;  %v682_v59 = vpop.f32.mrb[1].mxu1 }
 0x242   : > { %457 = vst [vmem:[%s268_s28] sm:$0xff] %v454_v58 }
 0x243   : > { %904 = shalt.err (!%p901_p2)
}
 0x244   : > { %s905_s12 = scalar_lea.hbm %s1216_s15, 128  ;;  %s909_s26 = scalar_lea.hbm %s1265_s5, 256 }
 0x245   : > { %p906_p13 = scmp.ne.s32.totalorder %s1216_s15, %s905_s12  ;;  %p910_p4 = scmp.lt.u32.totalorder %s1216_s15, %s1265_s5 }
 0x246   : > { %p911_p5 = scmp.lt.u32.totalorder %s909_s26, %s905_s12  ;;  %p913_p11 = scmp.lt.u32.totalorder %s905_s12, %s1216_s15 }
 0x247   : > { %p907_p6 = pnand %p906_p13, %p1279_p0 }
 0x248   : > { %p912_p8 = por %p911_p5, %p910_p4 }
 0x249   : > { %p908_p10 = pneg %p907_p6 }
 0x24a   : > { %p914_p1 = por %p913_p11, %p912_p8 }
 0x24c   : > { %p915_p3 = pnand %p914_p1, %p908_p10 }
 0x24e   : > { %918 = shalt.err (!%p915_p3)
}
 0x24f   : > { %741 = dma.vmem_to_hbm [thread:$0]  (%p1279_p0), %s1218_s7, 128, %s1216_s15, %s459_s16  }
 0x250 PF: > { %s484_s11 = sand.u32 1, %s949_s18   ;;  %p1280_p7 = scmp.ne.s32.totalorder %s1270_s25, 0 }
 0x251   : > { %p1281_p9 = scmp.ge.s32.totalorder %s961_s21, 2  ;;  %s485_s28 = scalar_lea.sflag [#allocation4], %s484_s11 }
 0x253   : > { %p755_p12 = pnand %p1281_p9, %p1280_p7 }
 0x255   : > { %944 = dma.done.wait (!%p755_p12), %s485_s28, 128  }
 0x256   : > { %946 = vsyncadd (!%p755_p12), %s485_s28, 4294967168  ;;  %p19_p2 = scmp.ge.s32.totalorder %s1112_s14, 4   ;;  %s1282_s18 = smov %s953_s19 }
 0x257   : > { %s1283_s19 = smov %s957_s20  ;;  %s1284_s20 = smov %s1128_s27 }
 0x258   : > { %s1285_s21 = smov %s1112_s14  ;;  %21 = sbr.rel (!%p19_p2) target bundleno = 6 (0x6), region = 93 }
 0x25f   :  { %490 = vsyncpa [#allocation3], 1 }
 0x260   :  { %492 = vsyncpa [#allocation3 + $0x1], 1 }
 0x261   :  { %493 = vsyncpa [#allocation6], 1 }
 0x262   :  { %494 = vsyncpa [#allocation4], 1 }
 0x263   :  { %496 = vsyncpa [#allocation4 + $0x1], 1 }

</bundles_post_ra>
